<compile_context>
chip_gen: v7x
topology: tpu7x:2x2x1
jax: 0.10.0
libtpu: 0.0.40
codegen_flags: <defaults>
</compile_context>

<pallas_src>
import functools

import jax
import jax.numpy as jnp
from jax.experimental import pallas as pl
from jax.experimental.pallas import tpu as pltpu


def _cdiv(a, b):
    return (a + b - 1) // b


def _round_up(x, m):
    return ((x + m - 1) // m) * m


def _linear_agg_kernel(*refs, n_heads):
    # refs = (x_ref_0, ..., x_ref_{n_heads-1}, w_ref, b_ref, o_ref)
    #   x_ref_h: [TM, PL]   packed activations for head h
    #   w_ref  : [n_heads, PL, PL]   block-diagonal (kron) per-head weights
    #   b_ref  : [1, PL]    tiled bias
    #   o_ref  : [TM, PL]   packed output
    x_refs = refs[:n_heads]
    w_ref = refs[n_heads]
    b_ref = refs[n_heads + 1]
    o_ref = refs[n_heads + 2]

    # First head's dot initializes the accumulator (no zeros pass / extra
    # full-tile intermediate); n_heads is small & static -> unrolled.
    acc = jnp.dot(x_refs[0][...], w_ref[0], preferred_element_type=jnp.float32)
    for h in range(1, n_heads):
        acc = acc + jnp.dot(
            x_refs[h][...], w_ref[h], preferred_element_type=jnp.float32
        )
    o_ref[...] = (acc + b_ref[...]).astype(o_ref.dtype)


@jax.jit
def linear_aggregate(x2d_list, w_packed, b_packed):
    """x2d_list: list of n_heads arrays [M, L];
    w_packed: [n_heads, P*L, P*L] block-diagonal per-head weights;
    b_packed: [1, P*L] tiled bias.

    Returns [M, L] == concat(x2d_list, -1) @ W_t + b.
    """
    n_heads = len(x2d_list)
    M, L = x2d_list[0].shape
    PL = w_packed.shape[1]
    P = PL // L                      # rows packed per 128-lane row
    dtype = x2d_list[0].dtype
    itemsize = jnp.dtype(dtype).itemsize

    # dtype-aware sublane granule: 8 (f32), 16 (bf16), 32 (int8)
    sub = max(8, 32 // itemsize)

    # Packed row count, balanced tiling (padding <= sub-1 packed rows per tile,
    # never "round M up to a full TM multiple").
    R = _cdiv(M, P)
    R8 = _round_up(R, sub)

    # Tile cap from a VMEM budget that fits the 16 MiB default scoped VMEM on
    # v5e (and trivially on v6e/v7x): double-buffered inputs + output, plus the
    # f32 accumulator intermediate.
    VMEM_BUDGET = 12 * 1024 * 1024
    bytes_per_row = (n_heads + 1) * 2 * PL * itemsize + PL * 4
    tm_cap = max(sub, VMEM_BUDGET // bytes_per_row)
    TM_MAX = min(8192, (tm_cap // sub) * sub)

    n_tiles = _cdiv(R8, TM_MAX)
    TM = _round_up(_cdiv(R8, n_tiles), sub)
    R_pad = n_tiles * TM
    M_total = R_pad * P

    # Pad (zeros -> padded rows are discarded) and do the free lane-dense reshape.
    def pack(x):
        if M_total != M:
            x = jnp.pad(x, ((0, M_total - M), (0, 0)))
        return x.reshape(R_pad, P * L)

    xp_list = [pack(x) for x in x2d_list]

    w_itemsize = jnp.dtype(w_packed.dtype).itemsize
    cost = pl.CostEstimate(
        flops=2 * R_pad * PL * PL * n_heads,
        transcendentals=0,
        bytes_accessed=(n_heads + 1) * R_pad * PL * itemsize
        + (n_heads * PL * PL + PL) * w_itemsize,
    )

    kernel = functools.partial(_linear_agg_kernel, n_heads=n_heads)

    x_specs = [pl.BlockSpec((TM, P * L), lambda i: (i, 0)) for _ in range(n_heads)]
    out = pl.pallas_call(
        kernel,
        out_shape=jax.ShapeDtypeStruct((R_pad, P * L), dtype),
        grid_spec=pltpu.PrefetchScalarGridSpec(
            num_scalar_prefetch=0,
            grid=(n_tiles,),
            in_specs=x_specs
            + [
                pl.BlockSpec((n_heads, PL, PL), lambda i: (0, 0, 0)),  # weights (resident)
                pl.BlockSpec((1, PL), lambda i: (0, 0)),               # bias (resident)
            ],
            out_specs=pl.BlockSpec((TM, P * L), lambda i: (i, 0)),
        ),
        compiler_params=pltpu.CompilerParams(
            dimension_semantics=("parallel",),
        ),
        cost_estimate=cost,
    )(*xp_list, w_packed, b_packed)

    out = out.reshape(M_total, L)
    if M_total != M:
        out = out[:M]
    return out


class LinearAggregatorPallas:
    """JAX/Pallas equivalent of the PyTorch LinearAggregator module."""

    def __init__(self, num_labels, n_heads, key):
        self.num_labels = num_labels
        self.n_heads = n_heads
        in_features = num_labels * n_heads
        out_features = num_labels

        # Deterministic init mirroring nn.Linear defaults:
        # U(-1/sqrt(in_features), 1/sqrt(in_features)) for weight and bias.
        kw, kb = jax.random.split(key)
        bound = 1.0 / float(jnp.sqrt(jnp.float32(in_features)))
        # PyTorch weight is [out, in]; store its transpose [in, out] so head h
        # uses rows [h*L, (h+1)*L).
        self.weight_t = jax.random.uniform(
            kw, (in_features, out_features), jnp.float32, -bound, bound
        )
        self.bias = jax.random.uniform(
            kb, (out_features,), jnp.float32, -bound, bound
        )

        # Build the lane-dense packed parameters ONCE:
        #   pack P = 128 // L rows per 128-lane row; per-head weight becomes the
        #   block-diagonal kron(I_P, w_h) so a packed row times it yields the
        #   packed output row.  Bias is tiled P times.
        L = num_labels
        P = max(1, 128 // L)
        self.pack_factor = P
        eye = jnp.eye(P, dtype=jnp.float32)
        w_blocks = []
        for h in range(n_heads):
            w_h = self.weight_t[h * L:(h + 1) * L, :]        # [L, L]
            w_blocks.append(jnp.kron(eye, w_h))               # [P*L, P*L]
        self.weight_packed = jnp.stack(w_blocks)               # [n_heads, P*L, P*L]
        self.bias_packed = jnp.tile(self.bias, (1, P))          # [1, P*L]

    def __call__(self, x_list):
        # No jnp.concatenate: each head feeds the kernel directly; the per-head
        # block-diagonal weights are applied inside the kernel.
        lead_shape = x_list[0].shape[:-1]
        x2d_list = [x.reshape(-1, self.num_labels) for x in x_list]
        out2d = linear_aggregate(x2d_list, self.weight_packed, self.bias_packed)
        return out2d.reshape(lead_shape + (self.num_labels,))


if __name__ == "__main__":
    key = jax.random.PRNGKey(0)
    k_params, k_x = jax.random.split(key)

    num_labels = 4
    n_heads = 3
    batch = 2
    seq = 8

    # n_heads per-head predictions, each [batch, seq, num_labels]
    xs_key = jax.random.split(k_x, n_heads)
    x_list = [
        jax.random.normal(xs_key[i], (batch, seq, num_labels), jnp.float32)
        for i in range(n_heads)
    ]

    module = LinearAggregatorPallas(num_labels, n_heads, k_params)
    y = module(x_list)
    y = jax.block_until_ready(y)

    # Reference check (plain JAX, mirrors torch: Linear(cat(x, -1))).
    x_cat = jnp.concatenate(x_list, axis=-1)
    y_ref = x_cat @ module.weight_t + module.bias
    assert y.shape == (batch, seq, num_labels)
    assert jnp.allclose(y, y_ref, atol=1e-5, rtol=1e-5)

    print("KERNEL_OK")
</pallas_src>

<mosaic_0001>
module attributes {stable_mosaic.version = 11 : i64} {
  func.func @_linear_agg_kernel(%arg0: i32, %arg1: memref<8x128xf32, #tpu.memory_space<vmem>>, %arg2: memref<8x128xf32, #tpu.memory_space<vmem>>, %arg3: memref<8x128xf32, #tpu.memory_space<vmem>>, %arg4: memref<3x128x128xf32, #tpu.memory_space<vmem>>, %arg5: memref<1x128xf32, #tpu.memory_space<vmem>>, %arg6: memref<8x128xf32, #tpu.memory_space<vmem>>) attributes {dimension_semantics = [#tpu.dimension_semantics<parallel>], iteration_bounds = array<i64: 1>, scalar_prefetch = 0 : i64, scratch_operands = 0 : i64, tpu.core_type = #tpu.core_type<tc>, window_params = [{transform_indices = @transform_0, window_bounds = array<i64: 8, 128>}, {transform_indices = @transform_1, window_bounds = array<i64: 8, 128>}, {transform_indices = @transform_2, window_bounds = array<i64: 8, 128>}, {pipeline_mode = #tpu.pipeline_mode<synchronous>, transform_indices = @transform_3, window_bounds = array<i64: 3, 128, 128>}, {pipeline_mode = #tpu.pipeline_mode<synchronous>, transform_indices = @transform_4, window_bounds = array<i64: 1, 128>}, {transform_indices = @transform_5, window_bounds = array<i64: 8, 128>}]} {
    %c0 = arith.constant 0 : index
    %c0_0 = arith.constant 0 : index
    %0 = vector.load %arg1[%c0, %c0_0] : memref<8x128xf32, #tpu.memory_space<vmem>>, vector<8x128xf32>
    %c0_1 = arith.constant 0 : index
    %c0_2 = arith.constant 0 : index
    %c0_3 = arith.constant 0 : index
    %1 = vector.load %arg4[%c0_1, %c0_2, %c0_3] : memref<3x128x128xf32, #tpu.memory_space<vmem>>, vector<1x128x128xf32>
    %2 = vector.shape_cast %1 : vector<1x128x128xf32> to vector<128x128xf32>
    %cst = arith.constant dense<0.000000e+00> : vector<8x128xf32>
    %3 = tpu.matmul %0, %2, %cst {dimension_numbers = #tpu.dot_dimension_numbers<[1], [0], [0], [1], [0, 0, 1, 1], [], []>} : vector<8x128xf32>, vector<128x128xf32>, vector<8x128xf32> -> vector<8x128xf32>
    %c0_4 = arith.constant 0 : index
    %c0_5 = arith.constant 0 : index
    %4 = vector.load %arg2[%c0_4, %c0_5] : memref<8x128xf32, #tpu.memory_space<vmem>>, vector<8x128xf32>
    %c1 = arith.constant 1 : index
    %c0_6 = arith.constant 0 : index
    %c0_7 = arith.constant 0 : index
    %5 = vector.load %arg4[%c1, %c0_6, %c0_7] : memref<3x128x128xf32, #tpu.memory_space<vmem>>, vector<1x128x128xf32>
    %6 = vector.shape_cast %5 : vector<1x128x128xf32> to vector<128x128xf32>
    %cst_8 = arith.constant dense<0.000000e+00> : vector<8x128xf32>
    %7 = tpu.matmul %4, %6, %cst_8 {dimension_numbers = #tpu.dot_dimension_numbers<[1], [0], [0], [1], [0, 0, 1, 1], [], []>} : vector<8x128xf32>, vector<128x128xf32>, vector<8x128xf32> -> vector<8x128xf32>
    %8 = arith.addf %3, %7 : vector<8x128xf32>
    %c0_9 = arith.constant 0 : index
    %c0_10 = arith.constant 0 : index
    %9 = vector.load %arg3[%c0_9, %c0_10] : memref<8x128xf32, #tpu.memory_space<vmem>>, vector<8x128xf32>
    %c2 = arith.constant 2 : index
    %c0_11 = arith.constant 0 : index
    %c0_12 = arith.constant 0 : index
    %10 = vector.load %arg4[%c2, %c0_11, %c0_12] : memref<3x128x128xf32, #tpu.memory_space<vmem>>, vector<1x128x128xf32>
    %11 = vector.shape_cast %10 : vector<1x128x128xf32> to vector<128x128xf32>
    %cst_13 = arith.constant dense<0.000000e+00> : vector<8x128xf32>
    %12 = tpu.matmul %9, %11, %cst_13 {dimension_numbers = #tpu.dot_dimension_numbers<[1], [0], [0], [1], [0, 0, 1, 1], [], []>} : vector<8x128xf32>, vector<128x128xf32>, vector<8x128xf32> -> vector<8x128xf32>
    %13 = arith.addf %8, %12 : vector<8x128xf32>
    %c0_14 = arith.constant 0 : index
    %c0_15 = arith.constant 0 : index
    %14 = vector.load %arg5[%c0_14, %c0_15] : memref<1x128xf32, #tpu.memory_space<vmem>>, vector<1x128xf32>
    %15 = vector.broadcast %14 : vector<1x128xf32> to vector<8x128xf32>
    %16 = arith.addf %13, %15 : vector<8x128xf32>
    %c0_16 = arith.constant 0 : index
    %c0_17 = arith.constant 0 : index
    %17 = vector.load %arg6[%c0_16, %c0_17] : memref<8x128xf32, #tpu.memory_space<vmem>>, vector<8x128xf32>
    tpu.vector_store %arg6[%c0_16, %c0_17], %16 {strides = array<i32>} : memref<8x128xf32, #tpu.memory_space<vmem>>, vector<8x128xf32>,
    return
  }
  func.func @transform_0(%arg0: i32) -> (i32, i32) {
    %c0_i32 = arith.constant 0 : i32
    %c0_i32_0 = arith.constant 0 : i32
    return %arg0, %c0_i32 : i32, i32
  }
  func.func @transform_1(%arg0: i32) -> (i32, i32) {
    %c0_i32 = arith.constant 0 : i32
    %c0_i32_0 = arith.constant 0 : i32
    return %arg0, %c0_i32 : i32, i32
  }
  func.func @transform_2(%arg0: i32) -> (i32, i32) {
    %c0_i32 = arith.constant 0 : i32
    %c0_i32_0 = arith.constant 0 : i32
    return %arg0, %c0_i32 : i32, i32
  }
  func.func @transform_3(%arg0: i32) -> (i32, i32, i32) {
    %c0_i32 = arith.constant 0 : i32
    %c0_i32_0 = arith.constant 0 : i32
    %c0_i32_1 = arith.constant 0 : i32
    %c0_i32_2 = arith.constant 0 : i32
    return %c0_i32, %c0_i32_0, %c0_i32_1 : i32, i32, i32
  }
  func.func @transform_4(%arg0: i32) -> (i32, i32) {
    %c0_i32 = arith.constant 0 : i32
    %c0_i32_0 = arith.constant 0 : i32
    %c0_i32_1 = arith.constant 0 : i32
    return %c0_i32, %c0_i32_0 : i32, i32
  }
  func.func @transform_5(%arg0: i32) -> (i32, i32) {
    %c0_i32 = arith.constant 0 : i32
    %c0_i32_0 = arith.constant 0 : i32
    return %arg0, %c0_i32 : i32, i32
  }
}

</mosaic_0001>

<bundles_post_ra>
// kernel: linear_aggregate.1
= control target key start
LH: loop header
LB: loop body
LE: loop exit
PB: predicated region body
PF: predicated region fallthrough
CT: control target
= control target key end

     0   :  { %v561_v0 = vmov 0.0|0.0   ;;  %vm562_vm0 = vmmov 0   ;;  %v563_v8 = vmov 0.0   ;;  %s783_s3 = inlined_call_operand.vmem [shape: f32[3,128,128], index: 3, kind: input, shape index: {}]   ;;  %s784_s1 = inlined_call_operand.vmem [shape: f32[8,128], index: 1, kind: input, shape index: {}]   ;;  %s785_s0 = inlined_call_operand.vmem [shape: f32[8,128], index: 0, kind: input, shape index: {}]   ;;  %s786_s2 = inlined_call_operand.vmem [shape: f32[8,128], index: 2, kind: input, shape index: {}]   ;;  %s787_s4 = inlined_call_operand.vmem [shape: f32[1,128], index: 4, kind: input, shape index: {}]   ;;  %s788_s5 = inlined_call_operand.vmem [shape: f32[8,128], index: 5, kind: output, shape index: {}]  }
   0x1   :  { %486 = vmatprep.subr.bf16.mxu0 %v561_v0  ;;  %v297_v1 = vld [vmem:[%s783_s3 + $0x80] sm:$0xff]  ;;  %v298_v2 = vld [vmem:[%s783_s3 + $0x88] sm:$0xff]  ;;  %510 = vmatprep.subr.bf16.mxu1 %v561_v0  ;;  %v299_v6 = vld [vmem:[%s783_s3 + $0x90] sm:$0xff] }
   0x2   :  { %v21_v3 = vld [vmem:[%s783_s3] sm:$0xff]  ;;  %v487_v4 = vpack.c.bf16 %v298_v2, %v297_v1  ;;  %v22_v5 = vld [vmem:[%s783_s3 + $0x8] sm:$0xff]  ;;  %v300_v7 = vld [vmem:[%s783_s3 + $0x98] sm:$0xff]  ;;  %413 = vmatprep.mubr.msk.f32.mxu0 %vm562_vm0, %v563_v8  ;;  %448 = vmatprep.mubr.msk.f32.mxu1 %vm562_vm0, %v563_v8 }
   0x3   :  { %v511_v9 = vpack.c.bf16 %v22_v5, %v21_v3  ;;  %v23_v10 = vld [vmem:[%s783_s3 + $0x10] sm:$0xff]  ;;  %v24_v11 = vld [vmem:[%s783_s3 + $0x18] sm:$0xff]  ;;  %v490_v12 = vpack.c.bf16 %v300_v7, %v299_v6  ;;  %v301_v14 = vld [vmem:[%s783_s3 + $0xa0] sm:$0xff] }
   0x4   :  { %488 = vmatpush3.bf16.msra.mxu0 %v487_v4  ;;  %v514_v13 = vpack.c.bf16 %v24_v11, %v23_v10  ;;  %v302_v15 = vld [vmem:[%s783_s3 + $0xa8] sm:$0xff]  ;;  %v25_v16 = vld [vmem:[%s783_s3 + $0x20] sm:$0xff]  ;;  %v303_v20 = vld [vmem:[%s783_s3 + $0xb0] sm:$0xff] }
   0x5   :  { %512 = vmatpush3.bf16.msra.mxu1 %v511_v9  ;;  %489 = vmatprep.subr.bf16.mxu0 %v561_v0  ;;  %v26_v17 = vld [vmem:[%s783_s3 + $0x28] sm:$0xff]  ;;  %v493_v18 = vpack.c.bf16 %v302_v15, %v301_v14  ;;  %v304_v21 = vld [vmem:[%s783_s3 + $0xb8] sm:$0xff]  ;;  %v27_v22 = vld [vmem:[%s783_s3 + $0x30] sm:$0xff] }
   0x6   :  { %513 = vmatprep.subr.bf16.mxu1 %v561_v0  ;;  %v517_v19 = vpack.c.bf16 %v26_v17, %v25_v16  ;;  %v28_v23 = vld [vmem:[%s783_s3 + $0x38] sm:$0xff]  ;;  %v496_v24 = vpack.c.bf16 %v304_v21, %v303_v20  ;;  %v305_v26 = vld [vmem:[%s783_s3 + $0xc0] sm:$0xff]  ;;  %v306_v27 = vld [vmem:[%s783_s3 + $0xc8] sm:$0xff] }
   0x7   :  { %v520_v25 = vpack.c.bf16 %v28_v23, %v27_v22  ;;  %v29_v28 = vld [vmem:[%s783_s3 + $0x40] sm:$0xff]  ;;  %v30_v29 = vld [vmem:[%s783_s3 + $0x48] sm:$0xff]  ;;  %v499_v30 = vpack.c.bf16 %v306_v27, %v305_v26  ;;  %v307_v32 = vld [vmem:[%s783_s3 + $0xd0] sm:$0xff] }
   0x8   :  { %491 = vmatpush3.bf16.msra.mxu0 %v490_v12  ;;  %v523_v31 = vpack.c.bf16 %v30_v29, %v29_v28  ;;  %v308_v33 = vld [vmem:[%s783_s3 + $0xd8] sm:$0xff]  ;;  %v31_v34 = vld [vmem:[%s783_s3 + $0x50] sm:$0xff]  ;;  %v309_v38 = vld [vmem:[%s783_s3 + $0xe0] sm:$0xff] }
   0x9   :  { %515 = vmatpush3.bf16.msra.mxu1 %v514_v13  ;;  %492 = vmatprep.subr.bf16.mxu0 %v561_v0  ;;  %v32_v35 = vld [vmem:[%s783_s3 + $0x58] sm:$0xff]  ;;  %v502_v36 = vpack.c.bf16 %v308_v33, %v307_v32  ;;  %v310_v39 = vld [vmem:[%s783_s3 + $0xe8] sm:$0xff]  ;;  %v33_v40 = vld [vmem:[%s783_s3 + $0x60] sm:$0xff] }
   0xa   :  { %516 = vmatprep.subr.bf16.mxu1 %v561_v0  ;;  %v526_v37 = vpack.c.bf16 %v32_v35, %v31_v34  ;;  %v34_v41 = vld [vmem:[%s783_s3 + $0x68] sm:$0xff]  ;;  %v505_v42 = vpack.c.bf16 %v310_v39, %v309_v38  ;;  %v311_v44 = vld [vmem:[%s783_s3 + $0xf0] sm:$0xff]  ;;  %v312_v45 = vld [vmem:[%s783_s3 + $0xf8] sm:$0xff] }
   0xb   :  { %v529_v43 = vpack.c.bf16 %v34_v41, %v33_v40  ;;  %v35_v46 = vld [vmem:[%s783_s3 + $0x70] sm:$0xff]  ;;  %v36_v47 = vld [vmem:[%s783_s3 + $0x78] sm:$0xff]  ;;  %v508_v48 = vpack.c.bf16 %v312_v45, %v311_v44  ;;  %v313_v50 = vld [vmem:[%s783_s3 + $0x100] sm:$0xff] }
   0xc   :  { %494 = vmatpush3.bf16.msra.mxu0 %v493_v18  ;;  %v532_v49 = vpack.c.bf16 %v36_v47, %v35_v46  ;;  %v314_v51 = vld [vmem:[%s783_s3 + $0x108] sm:$0xff]  ;;  %v37_v52 = vld [vmem:[%s784_s1] sm:$0xff]  ;;  %v315_v55 = vld [vmem:[%s783_s3 + $0x110] sm:$0xff] }
   0xd   :  { %518 = vmatpush3.bf16.msra.mxu1 %v517_v19  ;;  %495 = vmatprep.subr.bf16.mxu0 %v561_v0  ;;  %v535_v53 = vpack.c.bf16 %v314_v51, %v313_v50  ;;  %v20_v54 = vld [vmem:[%s785_s0] sm:$0xff]  ;;  %v316_v56 = vld [vmem:[%s783_s3 + $0x118] sm:$0xff]  ;;  %v318_v59 = vld [vmem:[%s783_s3 + $0x128] sm:$0xff] }
   0xe   :  { %519 = vmatprep.subr.bf16.mxu1 %v561_v0  ;;  %v538_v57 = vpack.c.bf16 %v316_v56, %v315_v55  ;;  %v317_v58 = vld [vmem:[%s783_s3 + $0x120] sm:$0xff]  ;;  %v319_v61 = vld [vmem:[%s783_s3 + $0x130] sm:$0xff]  ;;  %v320_v62 = vld [vmem:[%s783_s3 + $0x138] sm:$0xff] }
   0xf   :  { %v541_v60 = vpack.c.bf16 %v318_v59, %v317_v58  ;;  %v544_v63 = vpack.c.bf16 %v320_v62, %v319_v61  ;;  %v321_v1 = vld [vmem:[%s783_s3 + $0x140] sm:$0xff]  ;;  %v322_v2 = vld [vmem:[%s783_s3 + $0x148] sm:$0xff]  ;;  %v323_v4 = vld [vmem:[%s783_s3 + $0x150] sm:$0xff] }
  0x10   :  { %497 = vmatpush3.bf16.msra.mxu0 %v496_v24  ;;  %v547_v3 = vpack.c.bf16 %v322_v2, %v321_v1  ;;  %v324_v5 = vld [vmem:[%s783_s3 + $0x158] sm:$0xff]  ;;  %v325_v7 = vld [vmem:[%s783_s3 + $0x160] sm:$0xff]  ;;  %v327_v10 = vld [vmem:[%s783_s3 + $0x170] sm:$0xff] }
  0x11   :  { %521 = vmatpush3.bf16.msra.mxu1 %v520_v25  ;;  %498 = vmatprep.subr.bf16.mxu0 %v561_v0  ;;  %v550_v6 = vpack.c.bf16 %v324_v5, %v323_v4  ;;  %v328_v11 = vld [vmem:[%s783_s3 + $0x178] sm:$0xff]  ;;  %v195_v13 = vld [vmem:[%s786_s2] sm:$0xff] }
  0x12   :  { %522 = vmatprep.subr.bf16.mxu1 %v561_v0  ;;  %v556_v12 = vpack.c.bf16 %v328_v11, %v327_v10  ;;  %v329_v20 = vld [vmem:[%s787_s4] ss:$0 sm:$0xff] }
  0x14   :  { %500 = vmatpush3.bf16.msra.mxu0 %v499_v30 }
  0x15   :  { %524 = vmatpush3.bf16.msra.mxu1 %v523_v31  ;;  %501 = vmatprep.subr.bf16.mxu0 %v561_v0 }
  0x16   :  { %525 = vmatprep.subr.bf16.mxu1 %v561_v0 }
  0x18   :  { %503 = vmatpush3.bf16.msra.mxu0 %v502_v36 }
  0x19   :  { %527 = vmatpush3.bf16.msra.mxu1 %v526_v37  ;;  %504 = vmatprep.subr.bf16.mxu0 %v561_v0 }
  0x1a   :  { %528 = vmatprep.subr.bf16.mxu1 %v561_v0 }
  0x1c   :  { %506 = vmatpush3.bf16.msra.mxu0 %v505_v42 }
  0x1d   :  { %530 = vmatpush3.bf16.msra.mxu1 %v529_v43  ;;  %507 = vmatprep.subr.bf16.mxu0 %v561_v0 }
  0x1e   :  { %531 = vmatprep.subr.bf16.mxu1 %v561_v0 }
  0x20   :  { %509 = vmatpush3.bf16.msra.mxu0 %v508_v48 }
  0x21   :  { %533 = vmatpush3.bf16.msra.mxu1 %v532_v49  ;;  %534 = vmatprep.subr.bf16.mxu0 %v561_v0 }
  0x23   :  { %414 = vmatmul.mubr.f32.vlgmr.msra.gmra.mrb[0].mxu0 %v37_v52 }
  0x24   :  { %449 = vmatmul.mubr.f32.vlgmr.msra.gmra.mrb[0].mxu1 %v20_v54  ;;  %536 = vmatpush3.bf16.msra.mxu0 %v535_v53 }
  0x25   :  { %537 = vmatprep.subr.bf16.mxu0 %v561_v0  ;;  %483 = vmatprep.mubr.msk.f32.mxu0 %vm562_vm0, %v563_v8  ;;  %v326_v8 = vld [vmem:[%s783_s3 + $0x168] sm:$0xff] }
  0x26   :  { %v553_v9 = vpack.c.bf16 %v326_v8, %v325_v7 }
  0x28   :  { %539 = vmatpush3.bf16.msra.mxu0 %v538_v57 }
  0x29   :  { %540 = vmatprep.subr.bf16.mxu0 %v561_v0 }
  0x2c   :  { %542 = vmatpush3.bf16.msra.mxu0 %v541_v60 }
  0x2d   :  { %543 = vmatprep.subr.bf16.mxu0 %v561_v0 }
  0x30   :  { %545 = vmatpush3.bf16.msra.mxu0 %v544_v63 }
  0x31   :  { %546 = vmatprep.subr.bf16.mxu0 %v561_v0 }
  0x34   :  { %548 = vmatpush3.bf16.msra.mxu0 %v547_v3 }
  0x35   :  { %549 = vmatprep.subr.bf16.mxu0 %v561_v0 }
  0x38   :  { %551 = vmatpush3.bf16.msra.mxu0 %v550_v6 }
  0x39   :  { %552 = vmatprep.subr.bf16.mxu0 %v561_v0 }
  0x3c   :  { %554 = vmatpush3.bf16.msra.mxu0 %v553_v9 }
  0x3d   :  { %555 = vmatprep.subr.bf16.mxu0 %v561_v0 }
  0x40   :  { %557 = vmatpush3.bf16.msra.mxu0 %v556_v12 }
  0x43   :  { %484 = vmatmul.mubr.f32.vlgmr.msra.gmra.mrb[2].mxu0 %v195_v13 }
  0xf6   :  { %v121_v14 = vpop.f32.mrb[0].mxu0 }
  0xf7   :  { %v415_v15 = vpop.f32.mrb[1].mxu0  ;;  %v191_v16 = vpop.f32.mrb[0].mxu1 }
  0xf8   :  { %v192_v17 = vadd.f32 %v191_v16, %v121_v14  ;;  %v450_v18 = vpop.f32.mrb[1].mxu1 }
 0x116   :  { %v279_v19 = vpop.f32.mrb[2].mxu0 }
 0x117   :  { %v283_v21 = vadd.f32 %v279_v19, %v192_v17  ;;  %v485_v22 = vpop.f32.mrb[3].mxu0 }
 0x119   :  { %v291_v23 = vadd.f32 %v329_v20, %v283_v21 }
 0x11b   :  { %292 = vst [vmem:[%s788_s5] sm:$0xff] %v291_v23 }

</bundles_post_ra>
